<compile_context>
chip_gen: v7x
topology: tpu7x:2x2x1
jax: 0.10.0
libtpu: 0.0.40
codegen_flags: <defaults>
</compile_context>

<pallas_src>
import jax
import jax.numpy as jnp
from jax.experimental import pallas as pl
from jax.experimental.pallas import tpu as pltpu


def _round_up(n, m):
    return ((n + m - 1) // m) * m


def netvcm_kernel(x_ref,
                  w1_ref, b1_ref,
                  w2_ref, b2_ref,
                  w3_ref, b3_ref,
                  w4_ref, b4_ref,
                  o_ref):
    # In-kernel bf16 cast of the streamed f32 x tile (avoids a wrapper-side pass).
    x = x_ref[...].astype(jnp.bfloat16)
    # fc1 + relu (bf16 operands on the MXU, f32 accumulation, f32 vector math)
    h = jnp.dot(x, w1_ref[...], preferred_element_type=jnp.float32)
    h = jnp.maximum(h + b1_ref[...], 0.0)
    # fc2 + relu
    h = jnp.dot(h.astype(jnp.bfloat16), w2_ref[...],
                preferred_element_type=jnp.float32)
    h = jnp.maximum(h + b2_ref[...], 0.0)
    # fc3 + relu
    h = jnp.dot(h.astype(jnp.bfloat16), w3_ref[...],
                preferred_element_type=jnp.float32)
    h = jnp.maximum(h + b3_ref[...], 0.0)
    # fc4
    logits = jnp.dot(h.astype(jnp.bfloat16), w4_ref[...],
                     preferred_element_type=jnp.float32)
    logits = logits + b4_ref[...]
    # softmax along dim=1 (feature / lane axis), numerically stable
    m = jnp.max(logits, axis=-1, keepdims=True)
    e = jnp.exp(logits - m)
    denom = jnp.sum(e, axis=-1, keepdims=True)
    o_ref[...] = (e * pl.reciprocal(denom, approx=True)).astype(o_ref.dtype)


def _choose_tile(B, block_batch):
    """Pick (TB, B_padded).

    TB is a multiple of 8, capped at block_batch and at ~B/2 (so the grid keeps
    >= 2 steps for v7x megacore when the batch is large enough). Prefer a TB that
    divides B exactly (no padding copy); only fall back to padding for awkward
    batch sizes, and never accept a tiny divisor just to avoid the pad.
    """
    cap = min(block_batch, max(8, _round_up(max(1, (B + 1) // 2), 8)))
    cap = max(8, (cap // 8) * 8)
    min_accept = min(cap, 1024)  # don't take tiny tiles just to dodge padding
    if B % 8 == 0:
        tb = cap
        while tb >= min_accept:
            if B % tb == 0:
                return tb, B          # exact tiling, no pad
            tb -= 8
    return cap, _round_up(B, cap)     # fallback: pad up to one tile


def prepare_params(params):
    """One-time conversion (hoisted out of the per-call path):
    weights -> bf16, stored transposed [in, out]; biases -> f32 [1, F]."""
    return dict(
        w1=params["w1"].astype(jnp.bfloat16),
        b1=params["b1"].reshape(1, -1).astype(jnp.float32),
        w2=params["w2"].astype(jnp.bfloat16),
        b2=params["b2"].reshape(1, -1).astype(jnp.float32),
        w3=params["w3"].astype(jnp.bfloat16),
        b3=params["b3"].reshape(1, -1).astype(jnp.float32),
        w4=params["w4"].astype(jnp.bfloat16),
        b4=params["b4"].reshape(1, -1).astype(jnp.float32),
    )


def netvcm_forward(x, prepared, *, block_batch=4096):
    """x: [B, nInput] float32. prepared: output of prepare_params()."""
    B, n_in = x.shape
    w1, b1 = prepared["w1"], prepared["b1"]
    w2, b2 = prepared["w2"], prepared["b2"]
    w3, b3 = prepared["w3"], prepared["b3"]
    w4, b4 = prepared["w4"], prepared["b4"]
    h1, h2, h3 = w1.shape[1], w2.shape[1], w3.shape[1]
    n_out = w4.shape[1]

    TB, B_pad = _choose_tile(B, block_batch)
    x_in = x if B_pad == B else jnp.pad(x, ((0, B_pad - B), (0, 0)))
    grid = (B_pad // TB,)

    def batch_map(i):
        return (i, 0)

    def const_map(i):
        return (0, 0)

    in_specs = [
        pl.BlockSpec((TB, n_in), batch_map),       # x: streamed f32, double-buffered
        pl.BlockSpec(w1.shape, const_map),         # weights & biases: VMEM-resident
        pl.BlockSpec(b1.shape, const_map),
        pl.BlockSpec(w2.shape, const_map),
        pl.BlockSpec(b2.shape, const_map),
        pl.BlockSpec(w3.shape, const_map),
        pl.BlockSpec(b3.shape, const_map),
        pl.BlockSpec(w4.shape, const_map),
        pl.BlockSpec(b4.shape, const_map),
    ]

    weight_bytes = sum(int(a.size) * a.dtype.itemsize
                       for a in (w1, b1, w2, b2, w3, b3, w4, b4))
    cost = pl.CostEstimate(
        flops=2 * B_pad * (n_in * h1 + h1 * h2 + h2 * h3 + h3 * n_out),
        transcendentals=B_pad * n_out,
        bytes_accessed=B_pad * (n_in + n_out) * 4 + weight_bytes,
    )

    out = pl.pallas_call(
        netvcm_kernel,
        out_shape=jax.ShapeDtypeStruct((B_pad, n_out), jnp.float32),
        grid=grid,
        in_specs=in_specs,
        out_specs=pl.BlockSpec((TB, n_out), batch_map),
        compiler_params=pltpu.CompilerParams(
            dimension_semantics=("parallel",),     # megacore on v7x (grid >= 2 steps)
            vmem_limit_bytes=32 * 1024 * 1024,     # room for big tiles on v5e
        ),
        cost_estimate=cost,
    )(x_in, w1, b1, w2, b2, w3, b3, w4, b4)

    return out if B_pad == B else out[:B]


def init_params(key, n_input, n_hidden, n_output):
    """Deterministic synthetic init (PyTorch-Linear-style). Weights stored [in, out]."""
    keys = jax.random.split(key, 8)

    def lin(kw, kb, fan_in, fan_out):
        bound = 1.0 / jnp.sqrt(fan_in)
        w = jax.random.uniform(kw, (fan_in, fan_out), jnp.float32, -bound, bound)
        b = jax.random.uniform(kb, (fan_out,), jnp.float32, -bound, bound)
        return w, b

    w1, b1 = lin(keys[0], keys[1], n_input, n_hidden)
    w2, b2 = lin(keys[2], keys[3], n_hidden, n_hidden)
    w3, b3 = lin(keys[4], keys[5], n_hidden, n_hidden)
    w4, b4 = lin(keys[6], keys[7], n_hidden, n_output)
    return dict(w1=w1, b1=b1, w2=w2, b2=b2, w3=w3, b3=b3, w4=w4, b4=b4)


def _reference(x, params):
    """Pure-JAX f32 reference of the PyTorch forward (loose sanity check)."""
    h = jnp.maximum(x @ params["w1"] + params["b1"], 0.0)
    h = jnp.maximum(h @ params["w2"] + params["b2"], 0.0)
    h = jnp.maximum(h @ params["w3"] + params["b3"], 0.0)
    logits = h @ params["w4"] + params["b4"]
    return jax.nn.softmax(logits, axis=1)


if __name__ == "__main__":
    key = jax.random.PRNGKey(0)
    k_x, k_p = jax.random.split(key)

    batch, n_input, n_hidden, n_output = 8, 32, 64, 16
    x = jax.random.normal(k_x, (batch, n_input), jnp.float32)
    params = init_params(k_p, n_input, n_hidden, n_output)

    prepared = prepare_params(params)          # hoisted one-time conversion
    out = netvcm_forward(x, prepared)
    out = jax.block_until_ready(out)

    # sanity: shape, softmax rows sum to ~1, and close to the f32 reference
    assert out.shape == (batch, n_output)
    assert jnp.allclose(jnp.sum(out, axis=1), 1.0, atol=1e-2)
    ref = _reference(x, params)
    assert jnp.allclose(out, ref, atol=5e-2)

    print("KERNEL_OK")
</pallas_src>

<mosaic_0001>
module attributes {stable_mosaic.version = 11 : i64} {
  func.func @netvcm_kernel(%arg0: i32, %arg1: memref<8x32xf32, #tpu.memory_space<vmem>>, %arg2: memref<32x64xbf16, #tpu.memory_space<vmem>>, %arg3: memref<1x64xf32, #tpu.memory_space<vmem>>, %arg4: memref<64x64xbf16, #tpu.memory_space<vmem>>, %arg5: memref<1x64xf32, #tpu.memory_space<vmem>>, %arg6: memref<64x64xbf16, #tpu.memory_space<vmem>>, %arg7: memref<1x64xf32, #tpu.memory_space<vmem>>, %arg8: memref<64x16xbf16, #tpu.memory_space<vmem>>, %arg9: memref<1x16xf32, #tpu.memory_space<vmem>>, %arg10: memref<8x16xf32, #tpu.memory_space<vmem>>) attributes {dimension_semantics = [#tpu.dimension_semantics<parallel>], iteration_bounds = array<i64: 1>, scalar_prefetch = 0 : i64, scratch_operands = 0 : i64, tpu.core_type = #tpu.core_type<tc>, window_params = [{transform_indices = @transform_0, window_bounds = array<i64: 8, 32>}, {pipeline_mode = #tpu.pipeline_mode<synchronous>, transform_indices = @transform_1, window_bounds = array<i64: 32, 64>}, {pipeline_mode = #tpu.pipeline_mode<synchronous>, transform_indices = @transform_2, window_bounds = array<i64: 1, 64>}, {pipeline_mode = #tpu.pipeline_mode<synchronous>, transform_indices = @transform_3, window_bounds = array<i64: 64, 64>}, {pipeline_mode = #tpu.pipeline_mode<synchronous>, transform_indices = @transform_4, window_bounds = array<i64: 1, 64>}, {pipeline_mode = #tpu.pipeline_mode<synchronous>, transform_indices = @transform_5, window_bounds = array<i64: 64, 64>}, {pipeline_mode = #tpu.pipeline_mode<synchronous>, transform_indices = @transform_6, window_bounds = array<i64: 1, 64>}, {pipeline_mode = #tpu.pipeline_mode<synchronous>, transform_indices = @transform_7, window_bounds = array<i64: 64, 16>}, {pipeline_mode = #tpu.pipeline_mode<synchronous>, transform_indices = @transform_8, window_bounds = array<i64: 1, 16>}, {transform_indices = @transform_9, window_bounds = array<i64: 8, 16>}]} {
    %c0 = arith.constant 0 : index
    %c0_0 = arith.constant 0 : index
    %0 = vector.load %arg1[%c0, %c0_0] : memref<8x32xf32, #tpu.memory_space<vmem>>, vector<8x32xf32>
    %1 = arith.truncf %0 : vector<8x32xf32> to vector<8x32xbf16>
    %c0_1 = arith.constant 0 : index
    %c0_2 = arith.constant 0 : index
    %2 = vector.load %arg2[%c0_1, %c0_2] : memref<32x64xbf16, #tpu.memory_space<vmem>>, vector<32x64xbf16>
    %cst = arith.constant dense<0.000000e+00> : vector<8x64xf32>
    %3 = tpu.matmul %1, %2, %cst {dimension_numbers = #tpu.dot_dimension_numbers<[1], [0], [0], [1], [0, 0, 1, 1], [], []>} : vector<8x32xbf16>, vector<32x64xbf16>, vector<8x64xf32> -> vector<8x64xf32>
    %c0_3 = arith.constant 0 : index
    %c0_4 = arith.constant 0 : index
    %4 = vector.load %arg3[%c0_3, %c0_4] : memref<1x64xf32, #tpu.memory_space<vmem>>, vector<1x64xf32>
    %5 = vector.broadcast %4 : vector<1x64xf32> to vector<8x64xf32>
    %6 = arith.addf %3, %5 : vector<8x64xf32>
    %cst_5 = arith.constant 0.000000e+00 : f32
    %7 = vector.broadcast %cst_5 : f32 to vector<8x64xf32>
    %8 = arith.maximumf %6, %7 : vector<8x64xf32>
    %9 = arith.truncf %8 : vector<8x64xf32> to vector<8x64xbf16>
    %c0_6 = arith.constant 0 : index
    %c0_7 = arith.constant 0 : index
    %10 = vector.load %arg4[%c0_6, %c0_7] : memref<64x64xbf16, #tpu.memory_space<vmem>>, vector<64x64xbf16>
    %cst_8 = arith.constant dense<0.000000e+00> : vector<8x64xf32>
    %11 = tpu.matmul %9, %10, %cst_8 {dimension_numbers = #tpu.dot_dimension_numbers<[1], [0], [0], [1], [0, 0, 1, 1], [], []>} : vector<8x64xbf16>, vector<64x64xbf16>, vector<8x64xf32> -> vector<8x64xf32>
    %c0_9 = arith.constant 0 : index
    %c0_10 = arith.constant 0 : index
    %12 = vector.load %arg5[%c0_9, %c0_10] : memref<1x64xf32, #tpu.memory_space<vmem>>, vector<1x64xf32>
    %13 = vector.broadcast %12 : vector<1x64xf32> to vector<8x64xf32>
    %14 = arith.addf %11, %13 : vector<8x64xf32>
    %cst_11 = arith.constant 0.000000e+00 : f32
    %15 = vector.broadcast %cst_11 : f32 to vector<8x64xf32>
    %16 = arith.maximumf %14, %15 : vector<8x64xf32>
    %17 = arith.truncf %16 : vector<8x64xf32> to vector<8x64xbf16>
    %c0_12 = arith.constant 0 : index
    %c0_13 = arith.constant 0 : index
    %18 = vector.load %arg6[%c0_12, %c0_13] : memref<64x64xbf16, #tpu.memory_space<vmem>>, vector<64x64xbf16>
    %cst_14 = arith.constant dense<0.000000e+00> : vector<8x64xf32>
    %19 = tpu.matmul %17, %18, %cst_14 {dimension_numbers = #tpu.dot_dimension_numbers<[1], [0], [0], [1], [0, 0, 1, 1], [], []>} : vector<8x64xbf16>, vector<64x64xbf16>, vector<8x64xf32> -> vector<8x64xf32>
    %c0_15 = arith.constant 0 : index
    %c0_16 = arith.constant 0 : index
    %20 = vector.load %arg7[%c0_15, %c0_16] : memref<1x64xf32, #tpu.memory_space<vmem>>, vector<1x64xf32>
    %21 = vector.broadcast %20 : vector<1x64xf32> to vector<8x64xf32>
    %22 = arith.addf %19, %21 : vector<8x64xf32>
    %cst_17 = arith.constant 0.000000e+00 : f32
    %23 = vector.broadcast %cst_17 : f32 to vector<8x64xf32>
    %24 = arith.maximumf %22, %23 : vector<8x64xf32>
    %25 = arith.truncf %24 : vector<8x64xf32> to vector<8x64xbf16>
    %c0_18 = arith.constant 0 : index
    %c0_19 = arith.constant 0 : index
    %26 = vector.load %arg8[%c0_18, %c0_19] : memref<64x16xbf16, #tpu.memory_space<vmem>>, vector<64x16xbf16>
    %cst_20 = arith.constant dense<0.000000e+00> : vector<8x16xf32>
    %27 = tpu.matmul %25, %26, %cst_20 {dimension_numbers = #tpu.dot_dimension_numbers<[1], [0], [0], [1], [0, 0, 1, 1], [], []>} : vector<8x64xbf16>, vector<64x16xbf16>, vector<8x16xf32> -> vector<8x16xf32>
    %c0_21 = arith.constant 0 : index
    %c0_22 = arith.constant 0 : index
    %28 = vector.load %arg9[%c0_21, %c0_22] : memref<1x16xf32, #tpu.memory_space<vmem>>, vector<1x16xf32>
    %29 = vector.broadcast %28 : vector<1x16xf32> to vector<8x16xf32>
    %30 = arith.addf %27, %29 : vector<8x16xf32>
    %cst_23 = arith.constant dense<0xFF800000> : vector<8xf32>
    %31 = vector.multi_reduction <maximumf>, %30, %cst_23 [1] : vector<8x16xf32> to vector<8xf32>
    %32 = vector.shape_cast %31 : vector<8xf32> to vector<8x1xf32>
    %33 = vector.broadcast %32 : vector<8x1xf32> to vector<8x16xf32>
    %34 = arith.subf %30, %33 : vector<8x16xf32>
    %35 = math.exp %34 : vector<8x16xf32>
    %cst_24 = arith.constant dense<0.000000e+00> : vector<8xf32>
    %36 = vector.multi_reduction <add>, %35, %cst_24 [1] : vector<8x16xf32> to vector<8xf32>
    %37 = vector.shape_cast %36 : vector<8xf32> to vector<8x1xf32>
    %38 = tpu.reciprocal %37 {approx = true} : vector<8x1xf32> -> vector<8x1xf32>
    %39 = vector.broadcast %38 : vector<8x1xf32> to vector<8x16xf32>
    %40 = arith.mulf %35, %39 : vector<8x16xf32>
    %c0_25 = arith.constant 0 : index
    %c0_26 = arith.constant 0 : index
    %41 = vector.load %arg10[%c0_25, %c0_26] : memref<8x16xf32, #tpu.memory_space<vmem>>, vector<8x16xf32>
    tpu.vector_store %arg10[%c0_25, %c0_26], %40 {strides = array<i32>} : memref<8x16xf32, #tpu.memory_space<vmem>>, vector<8x16xf32>,
    return
  }
  func.func @transform_0(%arg0: i32) -> (i32, i32) {
    %c0_i32 = arith.constant 0 : i32
    %c0_i32_0 = arith.constant 0 : i32
    return %arg0, %c0_i32 : i32, i32
  }
  func.func @transform_1(%arg0: i32) -> (i32, i32) {
    %c0_i32 = arith.constant 0 : i32
    %c0_i32_0 = arith.constant 0 : i32
    %c0_i32_1 = arith.constant 0 : i32
    return %c0_i32, %c0_i32_0 : i32, i32
  }
  func.func @transform_2(%arg0: i32) -> (i32, i32) {
    %c0_i32 = arith.constant 0 : i32
    %c0_i32_0 = arith.constant 0 : i32
    %c0_i32_1 = arith.constant 0 : i32
    return %c0_i32, %c0_i32_0 : i32, i32
  }
  func.func @transform_3(%arg0: i32) -> (i32, i32) {
    %c0_i32 = arith.constant 0 : i32
    %c0_i32_0 = arith.constant 0 : i32
    %c0_i32_1 = arith.constant 0 : i32
    return %c0_i32, %c0_i32_0 : i32, i32
  }
  func.func @transform_4(%arg0: i32) -> (i32, i32) {
    %c0_i32 = arith.constant 0 : i32
    %c0_i32_0 = arith.constant 0 : i32
    %c0_i32_1 = arith.constant 0 : i32
    return %c0_i32, %c0_i32_0 : i32, i32
  }
  func.func @transform_5(%arg0: i32) -> (i32, i32) {
    %c0_i32 = arith.constant 0 : i32
    %c0_i32_0 = arith.constant 0 : i32
    %c0_i32_1 = arith.constant 0 : i32
    return %c0_i32, %c0_i32_0 : i32, i32
  }
  func.func @transform_6(%arg0: i32) -> (i32, i32) {
    %c0_i32 = arith.constant 0 : i32
    %c0_i32_0 = arith.constant 0 : i32
    %c0_i32_1 = arith.constant 0 : i32
    return %c0_i32, %c0_i32_0 : i32, i32
  }
  func.func @transform_7(%arg0: i32) -> (i32, i32) {
    %c0_i32 = arith.constant 0 : i32
    %c0_i32_0 = arith.constant 0 : i32
    %c0_i32_1 = arith.constant 0 : i32
    return %c0_i32, %c0_i32_0 : i32, i32
  }
  func.func @transform_8(%arg0: i32) -> (i32, i32) {
    %c0_i32 = arith.constant 0 : i32
    %c0_i32_0 = arith.constant 0 : i32
    %c0_i32_1 = arith.constant 0 : i32
    return %c0_i32, %c0_i32_0 : i32, i32
  }
  func.func @transform_9(%arg0: i32) -> (i32, i32) {
    %c0_i32 = arith.constant 0 : i32
    %c0_i32_0 = arith.constant 0 : i32
    return %arg0, %c0_i32 : i32, i32
  }
}

</mosaic_0001>

<bundles_post_ra>
// kernel: tpu_custom_call.1
= control target key start
LH: loop header
LB: loop body
LE: loop exit
PB: predicated region body
PF: predicated region fallthrough
CT: control target
= control target key end

     0   :  { %14 = vsyncpa [#allocation3], 0  ;;  %s762_s0 = inlined_call_operand.hbm [shape: f32[8,32], index: 0, kind: input, shape index: {}]   ;;  %s763_s1 = inlined_call_operand.vmem [shape: bf16[32,64], index: 1, kind: input, shape index: {}]   ;;  %s764_s2 = inlined_call_operand.vmem [shape: f32[1,64], index: 2, kind: input, shape index: {}]   ;;  %s765_s3 = inlined_call_operand.vmem [shape: bf16[64,64], index: 3, kind: input, shape index: {}]   ;;  %s766_s4 = inlined_call_operand.vmem [shape: f32[1,64], index: 4, kind: input, shape index: {}]   ;;  %s767_s5 = inlined_call_operand.hbm [shape: bf16[64,64], index: 5, kind: input, shape index: {}]   ;;  %s768_s6 = inlined_call_operand.vmem [shape: f32[1,64], index: 6, kind: input, shape index: {}]   ;;  %s769_s7 = inlined_call_operand.vmem [shape: bf16[64,16], index: 7, kind: input, shape index: {}]   ;;  %s770_s8 = inlined_call_operand.vmem [shape: f32[1,16], index: 8, kind: input, shape index: {}]   ;;  %s771_s9 = inlined_call_operand.hbm [shape: f32[8,16], index: 9, kind: output, shape index: {}]  }
   0x1   :  { %15 = vsyncpa [#allocation6], 0 }
   0x2   :  { %16 = vsyncpa [#allocation4], 0  ;;  %s592_s30 = smov [#allocation2]   ;;  %s593_s11 = smov [#allocation5]  }
   0x3   :  { %s23_s10 = sshll.u32 %s592_s30, 4  ;;  %s40_s12 = sshll.u32 %s593_s11, 4  ;;  %s24_s10 = int_to_ptr.vmem [resolvable:$true] %s23_s10  ;;  %s649_s12 = int_to_ptr.vmem [resolvable:$true] %s40_s12 }
   0x4   :  { %s520_s15 = scalar_lea.hbm %s762_s0, 128 }
   0x5   :  { %p521_p0 = scmp.ne.s32.totalorder %s762_s0, %s520_s15  ;;  %p524_p1 = scmp.lt.u32.totalorder %s520_s15, %s762_s0 }
   0x7   :  { %p526_p2 = pnand %p524_p1, %p521_p0 }
   0x9   :  { %529 = shalt.err (!%p526_p2)
}
   0xa   :  { %s530_s20 = scalar_lea.vmem %s24_s10, 128  ;;  %p535_p4 = scmp.lt.s32.totalorder %s24_s10, %s24_s10 }
   0xb   :  { %p531_p3 = scmp.ne.s32.totalorder %s24_s10, %s530_s20  ;;  %p536_p5 = scmp.lt.s32.totalorder %s530_s20, %s530_s20 }
   0xd   :  { %p537_p6 = por %p536_p5, %p535_p4 }
   0xf   :  { %p538_p7 = pnand %p537_p6, %p531_p3 }
  0x11   :  { %541 = shalt.err (!%p538_p7)
}
  0x12   :  { %26 = dma.hbm_to_vmem [thread:$0]  %s762_s0, 128, %s24_s10, [#allocation3]  }
  0x13   :  { %s542_s25 = scalar_lea.hbm %s767_s5, 512 }
  0x14   :  { %p543_p8 = scmp.ne.s32.totalorder %s767_s5, %s542_s25  ;;  %p546_p9 = scmp.lt.u32.totalorder %s542_s25, %s767_s5 }
  0x16   :  { %p548_p10 = pnand %p546_p9, %p543_p8 }
  0x18   :  { %551 = shalt.err (!%p548_p10)
}
  0x19   :  { %s552_s30 = scalar_lea.vmem %s649_s12, 512  ;;  %p557_p12 = scmp.lt.s32.totalorder %s649_s12, %s649_s12 }
  0x1a   :  { %p553_p11 = scmp.ne.s32.totalorder %s649_s12, %s552_s30  ;;  %p558_p13 = scmp.lt.s32.totalorder %s552_s30, %s552_s30 }
  0x1c   :  { %p559_p0 = por %p558_p13, %p557_p12 }
  0x1e   :  { %p560_p1 = pnand %p559_p0, %p553_p11 }
  0x20   :  { %563 = shalt.err (!%p560_p1)
}
  0x21   :  { %s594_s0 = smov 64   ;;  %s595_s10 = smov 4  }
  0x22   :  { %46 = dma.hbm_to_vmem [thread:$0]  %s767_s5, 512, %s649_s12, [#allocation6], %s594_s0, %s594_s0, %s595_s10  }
  0x23   :  { %586 = dma.done.wait [#allocation3], 128  }
  0x24   :  { %587 = vsyncadd [#allocation3], 4294967168 }
  0x25   :  { %588 = dma.done.wait [#allocation6], 512  }
  0x26   :  { %589 = vsyncadd [#allocation6], 4294966784  ;;  %v596_v0 = vmov 0.0   ;;  %vm597_vm0 = vmmov 0   ;;  %v502_v1 = vld [vmem:[%s763_s1] sm:$0xff]   ;;  %v503_v2 = vld [vmem:[%s763_s1 + $0x8] sm:$0xff]  }
  0x27   :  { %451 = vmatprep.subr.bf16.mxu0 %v596_v0  ;;  %455 = vmatprep.mubr.msk.bf16.mxu0 %vm597_vm0, %v596_v0  ;;  %v60_v3 = vld [vmem:[#allocation2] sm:$0xff]  ;;  %vm85_vm1 = vcmask 261120   ;;  %v505_v5 = vld [vmem:[%s765_s3 + $0x8] sm:$0xff]   ;;  %v506_v7 = vld [vmem:[%s765_s3 + $0x10] sm:$0xff]   ;;  %vm170_vm2 = vcmask 523264   ;;  %vm382_vm3 = vcmask 130048  }
  0x28   :  { %459 = vmatprep.subr.bf16.mxu1 %v596_v0  ;;  %467 = vmatprep.mubr.msk.bf16.mxu1 %vm597_vm0, %v596_v0  ;;  %v504_v4 = vld [vmem:[%s765_s3] sm:$0xff]   ;;  %v61_v6 = vpack.c.bf16 %v60_v3, %v60_v3  ;;  %v507_v8 = vld [vmem:[%s765_s3 + $0x18] sm:$0xff]   ;;  %v508_v9 = vld [vmem:[#allocation5] sm:$0xff]  }
  0x29   :  { %452 = vmatpush3.bf16.msra.mxu0 %v502_v1  ;;  %460 = vmatpush3.bf16.msra.mxu1 %v504_v4  ;;  %v509_v10 = vld [vmem:[#allocation5 + $0x8] sm:$0xff]   ;;  %v411_v11 = vld [vmem:[%s764_s2] ss:$0 sm:$0xff]  ;;  %v510_v19 = vld [vmem:[#allocation5 + $0x10] sm:$0xff]  }
  0x2a   :  { %453 = vmatprep.subr.bf16.mxu0 %v596_v0  ;;  %461 = vmatprep.subr.bf16.mxu1 %v596_v0  ;;  %v511_v20 = vld [vmem:[#allocation5 + $0x18] sm:$0xff]   ;;  %v513_v22 = vld [vmem:[%s769_s7 + $0x8] sm:$0xff]   ;;  %v514_v31 = vld [vmem:[%s769_s7 + $0x10] sm:$0xff]  }
  0x2b   :  { %v512_v21 = vld [vmem:[%s769_s7] sm:$0xff]   ;;  %v515_v32 = vld [vmem:[%s769_s7 + $0x18] sm:$0xff]  }
  0x2c   :  { %v415_v23 = vld [vmem:[%s766_s4] ss:$0 sm:$0xff] }
  0x2d   :  { %454 = vmatpush3.bf16.msra.mxu0 %v503_v2  ;;  %462 = vmatpush3.bf16.msra.mxu1 %v505_v5  ;;  %v421_v33 = vld [vmem:[%s768_s6] ss:$0 sm:$0xff]  ;;  %s598_s6 = smov [#allocation7]  }
  0x2e   :  { %471 = vmatprep.subr.bf16.mxu0 %v596_v0  ;;  %463 = vmatprep.subr.bf16.mxu1 %v596_v0  ;;  %v427_v41 = vld [vmem:[%s770_s8] ss:$0 sm:$0xff]  ;;  %s401_s7 = sshll.u32 %s598_s6, 4  ;;  %s402_s7 = int_to_ptr.vmem [resolvable:$true] %s401_s7 }
  0x2f   :  { %s564_s8 = scalar_lea.vmem %s402_s7, 128  ;;  %p569_p3 = scmp.lt.s32.totalorder %s402_s7, %s402_s7 }
  0x30   :  { %456 = vmatmul.mubr.msk.bf16.vlgmr.msra.gmra.mrb[0].mxu0 %vm85_vm1, %v61_v6  ;;  %p565_p2 = scmp.ne.s32.totalorder %s402_s7, %s564_s8  ;;  %p570_p4 = scmp.lt.s32.totalorder %s564_s8, %s564_s8 }
  0x31   :  { %479 = vmatprep.mubr.msk.bf16.mxu0 %vm597_vm0, %v596_v0  ;;  %464 = vmatpush3.bf16.msra.mxu1 %v506_v7 }
  0x32   :  { %465 = vmatprep.subr.bf16.mxu1 %v596_v0  ;;  %472 = vmatpush3.bf16.msra.mxu0 %v508_v9  ;;  %p571_p5 = por %p570_p4, %p569_p3 }
  0x33   :  { %473 = vmatprep.subr.bf16.mxu0 %v596_v0 }
  0x34   :  { %p572_p6 = pnand %p571_p5, %p565_p2 }
  0x35   :  { %466 = vmatpush3.bf16.msra.mxu1 %v507_v8 }
  0x36   :  { %483 = vmatprep.subr.bf16.mxu1 %v596_v0  ;;  %474 = vmatpush3.bf16.msra.mxu0 %v509_v10 }
  0x37   :  { %475 = vmatprep.subr.bf16.mxu0 %v596_v0 }
  0x3a   :  { %476 = vmatpush3.bf16.msra.mxu0 %v510_v19 }
  0x3b   :  { %477 = vmatprep.subr.bf16.mxu0 %v596_v0 }
  0x3e   :  { %478 = vmatpush3.bf16.msra.mxu0 %v511_v20 }
 0x103   :  { %v123_v12 = vpop.f32.mrb[0].mxu0 }
 0x104   :  { %v124_v13 = vadd.f32 %v411_v11, %v123_v12  ;;  %v457_v14 = vpop.f32.mrb[1].mxu0 }
 0x105   :  { %v126_v15 = vpop.f32.mrb[2].mxu0 }
 0x106   :  { %v129_v16 = vmax.f32 %v124_v13, 0.0  ;;  %v458_v17 = vpop.f32.mrb[3].mxu0 }
 0x108   :  { %v130_v18 = vpack.c.bf16 %v129_v16, %v129_v16 }
 0x10a   :  { %468 = vmatmul.mubr.msk.bf16.vlgmr.msra.gmra.mrb[0].mxu1 %vm170_vm2, %v130_v18 }
 0x10b   :  { %491 = vmatprep.mubr.msk.bf16.mxu1 %vm597_vm0, %v596_v0  ;;  %484 = vmatpush3.bf16.msra.mxu1 %v512_v21 }
 0x10c   :  { %485 = vmatprep.subr.bf16.mxu1 %v596_v0 }
 0x10f   :  { %486 = vmatpush3.bf16.msra.mxu1 %v513_v22 }
 0x110   :  { %487 = vmatprep.subr.bf16.mxu1 %v596_v0 }
 0x113   :  { %488 = vmatpush3.bf16.msra.mxu1 %v514_v31 }
 0x114   :  { %489 = vmatprep.subr.bf16.mxu1 %v596_v0 }
 0x117   :  { %490 = vmatpush3.bf16.msra.mxu1 %v515_v32 }
 0x1dd   :  { %v208_v24 = vpop.f32.mrb[0].mxu1 }
 0x1de   :  { %v209_v25 = vadd.f32 %v415_v23, %v208_v24  ;;  %v469_v26 = vpop.f32.mrb[1].mxu1 }
 0x1df   :  { %v211_v27 = vpop.f32.mrb[2].mxu1 }
 0x1e0   :  { %v214_v28 = vmax.f32 %v209_v25, 0.0  ;;  %v470_v29 = vpop.f32.mrb[3].mxu1 }
 0x1e2   :  { %v215_v30 = vpack.c.bf16 %v214_v28, %v214_v28 }
 0x1e4   :  { %480 = vmatmul.mubr.msk.bf16.vlgmr.msra.gmra.mrb[4].mxu0 %vm170_vm2, %v215_v30 }
 0x2b7   :  { %v292_v34 = vpop.f32.mrb[4].mxu0 }
 0x2b8   :  { %v293_v35 = vadd.f32 %v421_v33, %v292_v34  ;;  %v481_v36 = vpop.f32.mrb[5].mxu0 }
 0x2b9   :  { %v295_v37 = vpop.f32.mrb[6].mxu0 }
 0x2ba   :  { %v298_v38 = vmax.f32 %v293_v35, 0.0  ;;  %v482_v39 = vpop.f32.mrb[7].mxu0 }
 0x2bc   :  { %v299_v40 = vpack.c.bf16 %v298_v38, %v298_v38 }
 0x2be   :  { %492 = vmatmul.mubr.msk.bf16.vlgmr.msra.gmra.mrb[4].mxu1 %vm170_vm2, %v299_v40 }
 0x391   :  { %v376_v42 = vpop.f32.mrb[4].mxu1 }
 0x392   :  { %v377_v43 = vadd.f32 %v427_v41, %v376_v42  ;;  %v493_v44 = vpop.f32.mrb[5].mxu1 }
 0x393   :  { %v379_v45 = vpop.f32.mrb[6].mxu1 }
 0x394   :  { %v494_v46 = vpop.f32.mrb[7].mxu1  ;;  %v383_v47 = vsel %vm382_vm3, %v377_v43, -inf }
 0x395   :  { %384 = vmax.xlane.f32.xlu0 %v383_v47 }
 0x422   :  { %v385_v48 = vpop.xlane.xlu0 %384 }
 0x423   :  { %v386_v49 = vsub.f32 %v377_v43, %v385_v48 }
 0x425   :  { %v387_v50 = vmul.f32 1.442695, %v386_v49 }
 0x427   :  { %516 = vpow2.f32 %v387_v50 }
 0x431   :  { %v517_v51 = vpop.eup %516 }
 0x432   :  { %v389_v52 = vsel %vm382_vm3, %v517_v51, 0.0 }
 0x433   :  { %390 = vadd.xlane.f32.xlu0 %v389_v52 }
 0x4c0   :  { %v391_v53 = vpop.xlane.xlu0 %390 }
 0x4c1   :  { %518 = vrcp.f32 %v391_v53 }
 0x4cb   :  { %v519_v54 = vpop.eup %518 }
 0x4cc   :  { %v393_v55 = vmul.f32 %v519_v54, %v517_v51 }
 0x4ce   :  { %394 = vst.msk [vmem:[#allocation7] sm:$0xff] %vm382_vm3, %v393_v55 }
 0x4cf   :  { %575 = shalt.err (!%p572_p6)
}
 0x4d0   :  { %s576_s12 = scalar_lea.hbm %s771_s9, 128 }
 0x4d1   :  { %p577_p7 = scmp.ne.s32.totalorder %s771_s9, %s576_s12  ;;  %p580_p8 = scmp.lt.u32.totalorder %s576_s12, %s771_s9 }
 0x4d3   :  { %p582_p9 = pnand %p580_p8, %p577_p7 }
 0x4d5   :  { %585 = shalt.err (!%p582_p9)
}
 0x4d6   :  { %404 = dma.vmem_to_hbm [thread:$0]  %s402_s7, 128, %s771_s9, [#allocation4]  }
 0x4d7   :  { %590 = dma.done.wait [#allocation4], 128  }
 0x4d8   :  { %591 = vsyncadd [#allocation4], 4294967168 }
 0x4d9   :  { %408 = vsyncpa [#allocation3], 1 }
 0x4da   :  { %409 = vsyncpa [#allocation6], 1 }
 0x4db   :  { %410 = vsyncpa [#allocation4], 1 }

</bundles_post_ra>
